<compile_context>
chip_gen: v5e
topology: v5e:2x2
jax: 0.10.0
libtpu: 0.0.40
codegen_flags: <defaults>
</compile_context>

<pallas_src>
import numpy as np
import jax
import jax.numpy as jnp
from jax.experimental import pallas as pl
from jax.experimental.pallas import tpu as pltpu


# --------------------------------------------------------------------------
# Host-side glue: replay the torch narrow/copy loops into static source maps
# --------------------------------------------------------------------------
def _unpack_padding(padding):
    try:
        pad_l, pad_b, pad_r, pad_t = padding
    except TypeError:
        pad_l = pad_b = pad_r = pad_t = padding
    return int(pad_l), int(pad_b), int(pad_r), int(pad_t)


def _src_map(size_in, pad_lo, pad_hi):
    """Replays the torch narrow/copy loops along one axis. -1 means 'zero'."""
    size_out = size_in + pad_lo + pad_hi
    src = np.full((size_out,), -1, dtype=np.int64)
    src[pad_lo:pad_lo + size_in] = np.arange(size_in)
    for i in range(pad_lo):
        src[pad_lo - i - 1] = src[pad_lo + i]
    for i in range(pad_hi):
        src[size_out - pad_hi + i] = src[size_out - pad_hi - i - 1]
    return src


def _runs(src):
    """Group a source map into maximal (start, length, is_zero) runs of
    consecutive source indices (or of zero fill)."""
    runs = []
    i, n = 0, len(src)
    while i < n:
        if src[i] < 0:
            j = i
            while j < n and src[j] < 0:
                j += 1
            runs.append((0, j - i, True))
        else:
            j = i + 1
            while j < n and src[j] == src[j - 1] + 1:
                j += 1
            runs.append((int(src[i]), j - i, False))
        i = j
    return tuple(runs)


# --------------------------------------------------------------------------
# VMEM sizing helpers (Mosaic-padded (sublane, 128) tile footprint)
# --------------------------------------------------------------------------
def _padded_img_bytes(h, w, dtype):
    itemsize = jnp.dtype(dtype).itemsize
    sub = {4: 8, 2: 16, 1: 32}.get(itemsize, 8)
    hp = -(-h // sub) * sub
    wp = -(-w // 128) * 128
    return hp * wp * itemsize


def _choose_tc(NC, per_img_bytes, *, target_block_bytes=2 << 20, min_steps=8):
    """Largest exact divisor of NC whose block fits ~target and keeps >=min_steps
    grid steps; fall back to tc=1 (max pipelining / megacore balance)."""
    divs = sorted({d for i in range(1, int(NC ** 0.5) + 1) if NC % i == 0
                   for d in (i, NC // i)})
    fit = [d for d in divs if d * per_img_bytes <= target_block_bytes]
    good = [d for d in fit if NC // d >= min_steps]
    if good:
        return max(good)
    return 1


# --------------------------------------------------------------------------
# Pallas kernel: direct sub-view stores into o_ref (no concatenates)
# --------------------------------------------------------------------------
def _make_kernel(row_runs, col_runs, *, t0, l0, W_in, pad_l, H_out):
    def kernel(x_ref, o_ref):
        dt = o_ref.dtype
        tc = o_ref.shape[0]

        # 1) Row gather: fill the body column band [pad_l, pad_l + W_in) of
        #    o_ref. The big body run is one store; mirrored border rows are
        #    thin stores; -1 runs (only possible when pad > size) store zeros.
        r_off = 0
        for rs, rlen, rzero in row_runs:
            if rzero:
                o_ref[:, r_off:r_off + rlen, pad_l:pad_l + W_in] = (
                    jnp.zeros((tc, rlen, W_in), dt))
            else:
                o_ref[:, r_off:r_off + rlen, pad_l:pad_l + W_in] = (
                    x_ref[:, t0 + rs:t0 + rs + rlen, l0:l0 + W_in])
            r_off += rlen

        # 2) Column gather: mirrored border columns are copied from the now
        #    complete body band of o_ref (so they carry the already
        #    row-mirrored values, matching the torch ordering).
        c_off = 0
        for cs, clen, czero in col_runs:
            is_body = (not czero) and (c_off == pad_l) and (clen == W_in)
            if not is_body:
                if czero:
                    o_ref[:, :, c_off:c_off + clen] = (
                        jnp.zeros((tc, H_out, clen), dt))
                else:
                    o_ref[:, :, c_off:c_off + clen] = (
                        o_ref[:, :, pad_l + cs:pad_l + cs + clen])
            c_off += clen

    return kernel


# --------------------------------------------------------------------------
# Wrapper
# --------------------------------------------------------------------------
def symmetric_pad2d(x, padding):
    pad_l, pad_b, pad_r, pad_t = _unpack_padding(padding)
    assert x.ndim == 4, "only Dimension=4 implemented"
    N, C, H, W = x.shape
    h = H + pad_t + pad_b
    w = W + pad_l + pad_r
    assert w >= 1 and h >= 1, "input is too small"
    assert (w >= 2 * pad_l and w >= 2 * pad_r
            and h >= 2 * pad_t and h >= 2 * pad_b), "input is too small"

    # Negative pads crop the input; fold the crop into in-kernel offsets.
    t0, b0 = max(-pad_t, 0), max(-pad_b, 0)
    l0, r0 = max(-pad_l, 0), max(-pad_r, 0)
    H_in, W_in = H - t0 - b0, W - l0 - r0
    pt, pb = max(pad_t, 0), max(pad_b, 0)
    pl_, pr = max(pad_l, 0), max(pad_r, 0)
    H_out, W_out = H_in + pt + pb, W_in + pl_ + pr
    assert H_out == h and W_out == w

    row_runs = _runs(_src_map(H_in, pt, pb))
    col_runs = _runs(_src_map(W_in, pl_, pr))

    NC = N * C
    xf = x.reshape(NC, H, W)                      # free (leading-dim merge)

    # ---- block sizing against Mosaic-padded footprints -------------------
    in_img = _padded_img_bytes(H, W, x.dtype)
    out_img = _padded_img_bytes(H_out, W_out, x.dtype)
    per_img = in_img + out_img
    tc = _choose_tc(NC, per_img)
    grid = NC // tc                               # exact divisor: no padding

    # 2x double-buffered in + out blocks, plus slack for in-kernel temps.
    needed = 2 * tc * per_img + tc * out_img + (4 << 20)
    try:
        vmem_cap = pltpu.get_tpu_info().vmem_capacity_bytes
    except Exception:
        vmem_cap = 64 * 1024 * 1024               # conservative (v7x per-TC)
    vmem_limit = int(min(vmem_cap // 2, max(needed, 16 << 20)))

    kernel = _make_kernel(row_runs, col_runs, t0=t0, l0=l0,
                          W_in=W_in, pad_l=pl_, H_out=H_out)

    out = pl.pallas_call(
        kernel,
        out_shape=jax.ShapeDtypeStruct((NC, H_out, W_out), x.dtype),
        grid=(grid,),
        in_specs=[pl.BlockSpec((tc, H, W), lambda i: (i, 0, 0))],
        out_specs=pl.BlockSpec((tc, H_out, W_out), lambda i: (i, 0, 0)),
        compiler_params=pltpu.CompilerParams(
            dimension_semantics=("parallel",),
            vmem_limit_bytes=vmem_limit,
        ),
    )(xf)
    return out.reshape(N, C, H_out, W_out)        # free (leading-dim split)


# --------------------------------------------------------------------------
# Literal numpy transcription of SymmetricPad2d.forward for verification
# --------------------------------------------------------------------------
def _torch_ref_np(x, padding):
    pad_l, pad_b, pad_r, pad_t = _unpack_padding(padding)
    N, C, H, W = x.shape
    h = H + pad_t + pad_b
    w = W + pad_l + pad_r
    out = np.zeros((N, C, h, w), dtype=x.dtype)
    ci = x
    if pad_t < 0: ci = ci[:, :, -pad_t:, :]
    if pad_b < 0: ci = ci[:, :, :ci.shape[2] + pad_b, :]
    if pad_l < 0: ci = ci[:, :, :, -pad_l:]
    if pad_r < 0: ci = ci[:, :, :, :ci.shape[3] + pad_r]
    rs, re, cs, ce = 0, h, 0, w
    if pad_t > 0: rs = pad_t
    if pad_b > 0: re = h - pad_b
    if pad_l > 0: cs = pad_l
    if pad_r > 0: ce = w - pad_r
    out[:, :, rs:re, cs:ce] = ci
    for i in range(pad_t):
        out[:, :, pad_t - i - 1, :] = out[:, :, pad_t + i, :]
    for i in range(pad_b):
        out[:, :, h - pad_b + i, :] = out[:, :, h - pad_b - i - 1, :]
    for i in range(pad_l):
        out[:, :, :, pad_l - i - 1] = out[:, :, :, pad_l + i]
    for i in range(pad_r):
        out[:, :, :, w - pad_r + i] = out[:, :, :, w - pad_r - i - 1]
    return out


if __name__ == "__main__":
    key = jax.random.PRNGKey(0)
    x = jax.random.normal(key, (2, 4, 16, 16), dtype=jnp.float32)

    # (pad_l, pad_b, pad_r, pad_t) — module's unpack order
    padding = (2, 3, 1, 2)
    y = jax.block_until_ready(symmetric_pad2d(x, padding))
    ref = _torch_ref_np(np.asarray(x), padding)
    assert y.shape == ref.shape, (y.shape, ref.shape)
    assert y.dtype == x.dtype
    np.testing.assert_allclose(np.asarray(y), ref, rtol=0, atol=0)

    # scalar-padding constructor path
    y2 = jax.block_until_ready(symmetric_pad2d(x, 3))
    ref2 = _torch_ref_np(np.asarray(x), 3)
    np.testing.assert_allclose(np.asarray(y2), ref2, rtol=0, atol=0)

    # negative-padding (crop) path
    y3 = jax.block_until_ready(symmetric_pad2d(x, (-1, 2, 3, -2)))
    ref3 = _torch_ref_np(np.asarray(x), (-1, 2, 3, -2))
    np.testing.assert_allclose(np.asarray(y3), ref3, rtol=0, atol=0)

    # NC with few divisors (exercises tc fallback) + bf16 dtype path
    xb = jax.random.normal(jax.random.PRNGKey(1), (1, 3, 16, 16),
                           dtype=jnp.bfloat16)
    y4 = jax.block_until_ready(symmetric_pad2d(xb, (2, 1, 2, 1)))
    ref4 = _torch_ref_np(np.asarray(xb), (2, 1, 2, 1))
    assert y4.dtype == xb.dtype
    np.testing.assert_allclose(np.asarray(y4.astype(jnp.float32)),
                               ref4.astype(np.float32), rtol=0, atol=0)

    print("KERNEL_OK")
</pallas_src>

<mosaic_0001>
module attributes {stable_mosaic.version = 11 : i64} {
  func.func @kernel(%arg0: i32, %arg1: memref<1x16x16xf32, #tpu.memory_space<vmem>>, %arg2: memref<1x21x19xf32, #tpu.memory_space<vmem>>) attributes {dimension_semantics = [#tpu.dimension_semantics<parallel>], iteration_bounds = array<i64: 8>, scalar_prefetch = 0 : i64, scratch_operands = 0 : i64, tpu.core_type = #tpu.core_type<tc>, window_params = [{transform_indices = @transform_0, window_bounds = array<i64: 1, 16, 16>}, {transform_indices = @transform_1, window_bounds = array<i64: 1, 21, 19>}]} {
    %c0 = arith.constant 0 : index
    %c1 = arith.constant 1 : index
    %c0_0 = arith.constant 0 : index
    %0 = vector.load %arg1[%c0, %c1, %c0_0] : memref<1x16x16xf32, #tpu.memory_space<vmem>>, vector<1x1x16xf32>
    %c0_1 = arith.constant 0 : index
    %c0_2 = arith.constant 0 : index
    %c2 = arith.constant 2 : index
    %1 = vector.load %arg2[%c0_1, %c0_2, %c2] : memref<1x21x19xf32, #tpu.memory_space<vmem>>, vector<1x1x16xf32>
    tpu.vector_store %arg2[%c0_1, %c0_2, %c2], %0 {strides = array<i32>} : memref<1x21x19xf32, #tpu.memory_space<vmem>>, vector<1x1x16xf32>,
    %c0_3 = arith.constant 0 : index
    %c0_4 = arith.constant 0 : index
    %c0_5 = arith.constant 0 : index
    %2 = vector.load %arg1[%c0_3, %c0_4, %c0_5] : memref<1x16x16xf32, #tpu.memory_space<vmem>>, vector<1x1x16xf32>
    %c0_6 = arith.constant 0 : index
    %c1_7 = arith.constant 1 : index
    %c2_8 = arith.constant 2 : index
    %3 = vector.load %arg2[%c0_6, %c1_7, %c2_8] : memref<1x21x19xf32, #tpu.memory_space<vmem>>, vector<1x1x16xf32>
    tpu.vector_store %arg2[%c0_6, %c1_7, %c2_8], %2 {strides = array<i32>} : memref<1x21x19xf32, #tpu.memory_space<vmem>>, vector<1x1x16xf32>,
    %c0_9 = arith.constant 0 : index
    %c0_10 = arith.constant 0 : index
    %c0_11 = arith.constant 0 : index
    %4 = vector.load %arg1[%c0_9, %c0_10, %c0_11] : memref<1x16x16xf32, #tpu.memory_space<vmem>>, vector<1x16x16xf32>
    %c0_12 = arith.constant 0 : index
    %c2_13 = arith.constant 2 : index
    %c2_14 = arith.constant 2 : index
    %5 = vector.load %arg2[%c0_12, %c2_13, %c2_14] : memref<1x21x19xf32, #tpu.memory_space<vmem>>, vector<1x16x16xf32>
    tpu.vector_store %arg2[%c0_12, %c2_13, %c2_14], %4 {strides = array<i32>} : memref<1x21x19xf32, #tpu.memory_space<vmem>>, vector<1x16x16xf32>,
    %c0_15 = arith.constant 0 : index
    %c15 = arith.constant 15 : index
    %c0_16 = arith.constant 0 : index
    %6 = vector.load %arg1[%c0_15, %c15, %c0_16] : memref<1x16x16xf32, #tpu.memory_space<vmem>>, vector<1x1x16xf32>
    %c0_17 = arith.constant 0 : index
    %c18 = arith.constant 18 : index
    %c2_18 = arith.constant 2 : index
    %7 = vector.load %arg2[%c0_17, %c18, %c2_18] : memref<1x21x19xf32, #tpu.memory_space<vmem>>, vector<1x1x16xf32>
    tpu.vector_store %arg2[%c0_17, %c18, %c2_18], %6 {strides = array<i32>} : memref<1x21x19xf32, #tpu.memory_space<vmem>>, vector<1x1x16xf32>,
    %c0_19 = arith.constant 0 : index
    %c14 = arith.constant 14 : index
    %c0_20 = arith.constant 0 : index
    %8 = vector.load %arg1[%c0_19, %c14, %c0_20] : memref<1x16x16xf32, #tpu.memory_space<vmem>>, vector<1x1x16xf32>
    %c0_21 = arith.constant 0 : index
    %c19 = arith.constant 19 : index
    %c2_22 = arith.constant 2 : index
    %9 = vector.load %arg2[%c0_21, %c19, %c2_22] : memref<1x21x19xf32, #tpu.memory_space<vmem>>, vector<1x1x16xf32>
    tpu.vector_store %arg2[%c0_21, %c19, %c2_22], %8 {strides = array<i32>} : memref<1x21x19xf32, #tpu.memory_space<vmem>>, vector<1x1x16xf32>,
    %c0_23 = arith.constant 0 : index
    %c13 = arith.constant 13 : index
    %c0_24 = arith.constant 0 : index
    %10 = vector.load %arg1[%c0_23, %c13, %c0_24] : memref<1x16x16xf32, #tpu.memory_space<vmem>>, vector<1x1x16xf32>
    %c0_25 = arith.constant 0 : index
    %c20 = arith.constant 20 : index
    %c2_26 = arith.constant 2 : index
    %11 = vector.load %arg2[%c0_25, %c20, %c2_26] : memref<1x21x19xf32, #tpu.memory_space<vmem>>, vector<1x1x16xf32>
    tpu.vector_store %arg2[%c0_25, %c20, %c2_26], %10 {strides = array<i32>} : memref<1x21x19xf32, #tpu.memory_space<vmem>>, vector<1x1x16xf32>,
    %c0_27 = arith.constant 0 : index
    %c0_28 = arith.constant 0 : index
    %c3 = arith.constant 3 : index
    %12 = vector.load %arg2[%c0_27, %c0_28, %c3] : memref<1x21x19xf32, #tpu.memory_space<vmem>>, vector<1x21x1xf32>
    %c0_29 = arith.constant 0 : index
    %c0_30 = arith.constant 0 : index
    %c0_31 = arith.constant 0 : index
    %13 = vector.load %arg2[%c0_29, %c0_30, %c0_31] : memref<1x21x19xf32, #tpu.memory_space<vmem>>, vector<1x21x1xf32>
    tpu.vector_store %arg2[%c0_29, %c0_30, %c0_31], %12 {strides = array<i32>} : memref<1x21x19xf32, #tpu.memory_space<vmem>>, vector<1x21x1xf32>,
    %c0_32 = arith.constant 0 : index
    %c0_33 = arith.constant 0 : index
    %c2_34 = arith.constant 2 : index
    %14 = vector.load %arg2[%c0_32, %c0_33, %c2_34] : memref<1x21x19xf32, #tpu.memory_space<vmem>>, vector<1x21x1xf32>
    %c0_35 = arith.constant 0 : index
    %c0_36 = arith.constant 0 : index
    %c1_37 = arith.constant 1 : index
    %15 = vector.load %arg2[%c0_35, %c0_36, %c1_37] : memref<1x21x19xf32, #tpu.memory_space<vmem>>, vector<1x21x1xf32>
    tpu.vector_store %arg2[%c0_35, %c0_36, %c1_37], %14 {strides = array<i32>} : memref<1x21x19xf32, #tpu.memory_space<vmem>>, vector<1x21x1xf32>,
    %c0_38 = arith.constant 0 : index
    %c0_39 = arith.constant 0 : index
    %c17 = arith.constant 17 : index
    %16 = vector.load %arg2[%c0_38, %c0_39, %c17] : memref<1x21x19xf32, #tpu.memory_space<vmem>>, vector<1x21x1xf32>
    %c0_40 = arith.constant 0 : index
    %c0_41 = arith.constant 0 : index
    %c18_42 = arith.constant 18 : index
    %17 = vector.load %arg2[%c0_40, %c0_41, %c18_42] : memref<1x21x19xf32, #tpu.memory_space<vmem>>, vector<1x21x1xf32>
    tpu.vector_store %arg2[%c0_40, %c0_41, %c18_42], %16 {strides = array<i32>} : memref<1x21x19xf32, #tpu.memory_space<vmem>>, vector<1x21x1xf32>,
    return
  }
  func.func @transform_0(%arg0: i32) -> (i32, i32, i32) {
    %c0_i32 = arith.constant 0 : i32
    %c0_i32_0 = arith.constant 0 : i32
    %c0_i32_1 = arith.constant 0 : i32
    return %arg0, %c0_i32, %c0_i32_0 : i32, i32, i32
  }
  func.func @transform_1(%arg0: i32) -> (i32, i32, i32) {
    %c0_i32 = arith.constant 0 : i32
    %c0_i32_0 = arith.constant 0 : i32
    %c0_i32_1 = arith.constant 0 : i32
    return %arg0, %c0_i32, %c0_i32_0 : i32, i32, i32
  }
}

</mosaic_0001>

<bundles_post_ra>
// kernel: tpu_custom_call.1
= control target key start
LH: loop header
LB: loop body
LE: loop exit
PB: predicated region body
PF: predicated region fallthrough
CT: control target
= control target key end

     0   :  { %6 = vsyncpa [#allocation3], 0  ;;  %s574_s0 = inlined_call_operand.hbm [shape: f32[8,16,16], index: 0, kind: input, shape index: {}]   ;;  %s575_s1 = inlined_call_operand.vmem [shape: f32[8,21,19], index: 1, kind: output, shape index: {}]  }
   0x1   :  { %8 = vsyncpa [#allocation3 + $0x1], 0  ;;  %s450_s6 = smov 0   ;;  %s452_s7 = smov 0  }
   0x2   :  { %s454_s8 = smov 0   ;;  %s456_s9 = smov 0  }
   0x3 LB: > { %s469_s10 = sadd.s32 4294967295, %s432_s9   ;;  %s472_s11 = sadd.s32 1, %s432_s9   ;;  %s432_s9 = sphi %s456_s9, %s582_s9   ;;  %s428_s8 = sphi %s454_s8, %s581_s8   ;;  %s424_s7 = sphi %s452_s7, %s580_s7   ;;  %s420_s6 = sphi %s450_s6, %s579_s6  }
   0x4   : > { %s18_s12 = ssub.s32 %s432_s9, %s472_s11  ;;  %s21_s13 = sadd.s32 1, %s428_s8 }
   0x5   : > { %p19_p0 = scmp.eq.s32.totalorder %s18_s12, 0  ;;  %p28_p1 = scmp.ne.s32.totalorder %s428_s8, %s424_s7 }
   0x6   : > { %p29_p2 = scmp.eq.s32.totalorder %s432_s9, 0  ;;  %p34_p3 = scmp.ne.s32.totalorder %s424_s7, %s420_s6 }
   0x7   : > { %s482_s14 = scalar_select %p19_p0, %s428_s8, %s21_s13  }
   0x8   : > { %p484_p4 = por %p29_p2, %p28_p1  ;;  %p35_p5 = scmp.eq.s32.totalorder %s469_s10, 0 }
   0x9   : > { %p329_p6 = scmp.lt.s32.totalorder %s432_s9, 8  ;;  %s84_s17 = sand.u32 1, %s428_s8  }
   0xa   : > { %p490_p7 = por %p35_p5, %p34_p3  ;;  %s313_s18 = sshll.u32 %s84_s17, 4 }
   0xb   : > { %s321_s19 = sshll.u32 %s432_s9, 4  ;;  %s88_s23 = scalar_lea.vmem [#allocation2], %s313_s18 }
   0xc   : > { %s93_s22 = scalar_lea.hbm %s574_s0, %s321_s19  ;;  %s96_s24 = sshll.u32 %s88_s23, 4  ;;  %s97_s24 = int_to_ptr.vmem [resolvable:$true] %s96_s24 }
   0xd   : > { %s94_s25 = sshll.u32 %s93_s22, 4  ;;  %p501_p8 = pnand %p329_p6, %p484_p4  ;;  %s95_s25 = int_to_ptr.hbm [resolvable:$true] %s94_s25 }
   0xe   : > { %p316_p9 = scmp.ge.s32.totalorder %s432_s9, 1  ;;  %s85_s27 = scalar_lea.sflag [#allocation3], %s84_s17 }
   0xf   : > { %s368_s28 = sshra.s32 %s95_s25, 4  ;;  %p372_p11 = pneg %p501_p8  ;;  %s369_s28 = int_to_ptr.hbm [resolvable:$true] %s368_s28 }
  0x10   : > { %s370_s29 = scalar_lea.hbm %s369_s28, 16  ;;  %s375_s3 = scalar_lea.hbm %s574_s0, 128 }
  0x11   : > { %p371_p10 = scmp.ne.s32.totalorder %s369_s28, %s370_s29  ;;  %p376_p0 = scmp.lt.s32.totalorder %s369_s28, %s574_s0 }
  0x12   : > { %p377_p1 = scmp.lt.s32.totalorder %s375_s3, %s370_s29 }
  0x13   : > { %p373_p12 = pnand %p372_p11, %p371_p10 }
  0x14   : > { %p378_p2 = por %p377_p1, %p376_p0 }
  0x15   : > { %p374_p13 = pneg %p373_p12 }
  0x17   : > { %p379_p3 = pnand %p378_p2, %p374_p13 }
  0x19   : > { %382 = shalt.err (!%p379_p3)
}
  0x1a   : > { %s434_s6 = smov 128   ;;  %s435_s12 = smov 8  }
  0x1b   : > { %328 = dma.hbm_to_vmem [thread:$0]  (!%p501_p8), %s95_s25, 256, %s97_s24, %s85_s27, %s434_s6, %s434_s6, %s435_s12  }
  0x1c   : > { %p104_p4 = scmp.lt.s32.totalorder %s432_s9, 9 }
  0x1e   : > { %p105_p5 = pnand %p316_p9, %p104_p4 }
  0x1f   : > { %s110_s13 = sand.u32 (!%p105_p5), 1, %s424_s7  }
  0x20   : > { %108 = sbr.rel (%p105_p5) target bundleno = 541 (0x21d), region = 24  ;;  %s317_s15 = sshll.u32 (!%p105_p5), %s110_s13, 4 }
  0x21   : > { %s111_s17 = scalar_lea.sflag (!%p105_p5), [#allocation3], %s110_s13  ;;  %s114_s18 = scalar_lea.vmem (!%p105_p5), [#allocation2], %s317_s15 }
  0x25   : > { %415 = dma.done.wait (%p490_p7), %s111_s17, 256  }
  0x26   : > { %417 = vsyncadd (%p490_p7), %s111_s17, 4294967040  ;;  %v152_v0 = vld [vmem:[%s114_s18] sm:$0xff]  ;;  %s436_s19 = smov 2   ;;  %v165_v2 = vld [vmem:[%s114_s18 + $0xf] sm:$0x1]  ;;  %p134_p6 = scmp.lt.s32.totalorder %s469_s10, 7 }
  0x27   : > { %v139_v1 = vld [vmem:[%s114_s18 + $0x1] sm:$0x1]  ;;  %156 = vrot.lane.b32.xlu1 %v152_v0, %s436_s19  ;;  %167 = vrot.lane.b32.xlu2 %v165_v2, %s436_s19  ;;  %v153_v3 = vld [vmem:[%s114_s18 + $0x8] sm:$0xff]  ;;  %vm144_vm0 = vcmask 139280   ;;  %vm162_vm1 = vcmask 146448   ;;  %vm198_vm2 = vcmask 7168  }
  0x28   : > { %141 = vrot.lane.b32.xlu0 %v139_v1, %s436_s19  ;;  %v146_v4 = vld [vmem:[%s114_s18] sm:$0x1]  ;;  %v171_v5 = vld [vmem:[%s114_s18 + $0xe] sm:$0x1]  ;;  %v177_v6 = vld [vmem:[%s114_s18 + $0xd] sm:$0x1] }
  0x29   : > { %s584_s10 = smov (!%p134_p6, %s469_s10), 7  ;;  %s438_s22 = smov 127   ;;  %vm201_vm3 = vcmask 4096   ;;  %vm218_vm4 = vcmask 15368   ;;  %vm221_vm5 = vcmask 12296   ;;  %vm238_vm6 = vcmask 154768  }
  0x2a   : > { %s322_s9 = smul.u32 24, %s584_s10  ;;  %s437_s10 = smov 125   ;;  %vm241_vm7 = vcmask 151696  }
  0x2b   : > { %s439_s23 = smov 1  }
  0x2c   : > { %s529_s21 = scalar_lea.vmem %s575_s1, %s322_s9 }
  0x2f   : > { %158 = vrot.lane.b32.xlu1 %v153_v3, %s436_s19  ;;  %173 = vrot.lane.b32.xlu2 %v171_v5, %s436_s19 }
  0x30   : > { %148 = vrot.lane.b32.xlu0 %v146_v4, %s436_s19 }
  0x38   : > { %179 = vrot.lane.b32.xlu0 %v177_v6, %s436_s19 }
  0x81   : > { %v168_v7 = vpop.permute.xlu2 %167 }
  0x82   : > { %170 = vst.msk [vmem:[%s529_s21 + $0x12] sm:$0x1] %vm144_vm0, %v168_v7 }
  0x89   : > { %v174_v8 = vpop.permute.xlu2 %173 }
  0x8a   : > { %176 = vst.msk [vmem:[%s529_s21 + $0x13] sm:$0x1] %vm144_vm0, %v174_v8 }
  0x99   : > { %v157_v9 = vpop.permute.xlu1 %156 }
  0x9a   : > { %v142_v10 = vpop.permute.xlu0 %141  ;;  %163 = vst.msk [vmem:[%s529_s21 + $0x2] sm:$0xff] %vm162_vm1, %v157_v9 }
  0x9b   : > { %145 = vst.msk [vmem:[%s529_s21] sm:$0x1] %vm144_vm0, %v142_v10 }
  0xa1   : > { %v159_v11 = vpop.permute.xlu1 %158 }
  0xa2   : > { %v149_v12 = vpop.permute.xlu0 %148  ;;  %164 = vst.msk [vmem:[%s529_s21 + $0xa] sm:$0xff] %vm162_vm1, %v159_v11 }
  0xa3   : > { %151 = vst.msk [vmem:[%s529_s21 + $0x1] sm:$0x1] %vm144_vm0, %v149_v12 }
  0xa9   : > { %v184_v14 = vld [vmem:[%s529_s21 + $0x8] sm:$0xff] }
  0xaa   : > { %v180_v13 = vpop.permute.xlu0 %179  ;;  %191 = vrot.lane.b32.xlu2 %v184_v14, %s437_s10  ;;  %v183_v15 = vld [vmem:[%s529_s21] sm:$0xff] }
  0xab   : > { %182 = vst.msk [vmem:[%s529_s21 + $0x14] sm:$0x1] %vm144_vm0, %v180_v13  ;;  %189 = vrot.lane.b32.xlu1 %v183_v15, %s437_s10 }
  0xb2   : > { %v185_v16 = vld [vmem:[%s529_s21 + $0x10] sm:$0x1f] }
  0xb3   : > { %193 = vrot.lane.b32.xlu0 %v185_v16, %s437_s10 }
 0x104   : > { %v192_v17 = vpop.permute.xlu2 %191 }
 0x105   : > { %200 = vst.msk [vmem:[%s529_s21 + $0x8] sm:$0xff] %vm198_vm2, %v192_v17 }
 0x10c   : > { %v204_v18 = vld [vmem:[%s529_s21 + $0x8] sm:$0xff] }
 0x10d   : > { %211 = vrot.lane.b32.xlu2 %v204_v18, %s438_s22 }
 0x11d   : > { %v190_v19 = vpop.permute.xlu1 %189 }
 0x11e   : > { %199 = vst.msk [vmem:[%s529_s21] sm:$0xff] %vm198_vm2, %v190_v19 }
 0x125   : > { %v194_v20 = vpop.permute.xlu0 %193  ;;  %v203_v21 = vld [vmem:[%s529_s21] sm:$0xff] }
 0x126   : > { %202 = vst.msk [vmem:[%s529_s21 + $0x10] sm:$0x1f] %vm201_vm3, %v194_v20  ;;  %209 = vrot.lane.b32.xlu1 %v203_v21, %s438_s22 }
 0x12d   : > { %v205_v22 = vld [vmem:[%s529_s21 + $0x10] sm:$0x1f] }
 0x12e   : > { %213 = vrot.lane.b32.xlu0 %v205_v22, %s438_s22 }
 0x167   : > { %v212_v23 = vpop.permute.xlu2 %211 }
 0x168   : > { %220 = vst.msk [vmem:[%s529_s21 + $0x8] sm:$0xff] %vm218_vm4, %v212_v23 }
 0x16f   : > { %v224_v24 = vld [vmem:[%s529_s21 + $0x8] sm:$0xff] }
 0x170   : > { %231 = vrot.lane.b32.xlu2 %v224_v24, %s439_s23 }
 0x198   : > { %v210_v25 = vpop.permute.xlu1 %209 }
 0x199   : > { %219 = vst.msk [vmem:[%s529_s21] sm:$0xff] %vm218_vm4, %v210_v25 }
 0x1a0   : > { %v214_v26 = vpop.permute.xlu0 %213  ;;  %v223_v27 = vld [vmem:[%s529_s21] sm:$0xff] }
 0x1a1   : > { %222 = vst.msk [vmem:[%s529_s21 + $0x10] sm:$0x1f] %vm221_vm5, %v214_v26  ;;  %229 = vrot.lane.b32.xlu1 %v223_v27, %s439_s23 }
 0x1a8   : > { %v225_v28 = vld [vmem:[%s529_s21 + $0x10] sm:$0x1f] }
 0x1a9   : > { %233 = vrot.lane.b32.xlu0 %v225_v28, %s439_s23 }
 0x1ca   : > { %v232_v29 = vpop.permute.xlu2 %231 }
 0x1cb   : > { %240 = vst.msk [vmem:[%s529_s21 + $0x8] sm:$0xff] %vm238_vm6, %v232_v29 }
 0x213   : > { %v230_v30 = vpop.permute.xlu1 %229 }
 0x214   : > { %239 = vst.msk [vmem:[%s529_s21] sm:$0xff] %vm238_vm6, %v230_v30 }
 0x21b   : > { %v234_v31 = vpop.permute.xlu0 %233 }
 0x21c   : > { %242 = vst.msk [vmem:[%s529_s21 + $0x10] sm:$0x1f] %vm241_vm7, %v234_v31 }
 0x21d PF: > { %p11_p7 = scmp.ge.s32.totalorder %s472_s11, 10   ;;  %s579_s6 = smov %s424_s7 }
 0x21e   : > { %s580_s7 = smov %s428_s8  ;;  %s581_s8 = smov %s482_s14 }
 0x21f   : > { %s582_s9 = smov %s472_s11  ;;  %13 = sbr.rel (!%p11_p7) target bundleno = 3 (0x3), region = 64 }
 0x224   :  { %264 = vsyncpa [#allocation3], 1 }
 0x225   :  { %266 = vsyncpa [#allocation3 + $0x1], 1 }

</bundles_post_ra>
